<compile_context>
chip_gen: v6e
topology: v6e:2x2x1
jax: 0.10.0
libtpu: 0.0.40
codegen_flags: <defaults>
</compile_context>

<pallas_src>
import functools
import math

import jax
import jax.numpy as jnp
from jax.experimental import pallas as pl
from jax.experimental.pallas import tpu as pltpu

LANE = 128
SUBLANE = 8


def _round_up(v, m):
    return ((v + m - 1) // m) * m


def _pick_tm(n, target=256):
    """Largest row tile <= target that divides n and is a multiple of 8."""
    if n <= target:
        return n
    for tm in (target, 128, 64, 32, 16, 8):
        if n % tm == 0:
            return tm
    return n


def _compiler_params(tm, n, f_pad, h_pad, out_pad):
    bf16, f32 = 2, 4
    est = (2 * tm * n * bf16            # A row tile, double-buffered
           + 2 * n * h_pad * bf16       # resident h_prev (constant block index)
           + 2 * n * f_pad * bf16       # resident x
           + 4 * tm * h_pad * f32       # f32 accumulators / h output buffers
           + 2 * tm * out_pad * f32     # y output buffers
           + 2 * f_pad * 2 * h_pad * bf16
           + 2 * h_pad * 2 * h_pad * bf16
           + 2 * h_pad * out_pad * bf16)
    limit = int(min(max(32 * 1024 * 1024, 2 * est), 64 * 1024 * 1024))
    return pltpu.CompilerParams(
        dimension_semantics=("parallel",),
        vmem_limit_bytes=limit)


# ----------------------------- Pallas kernels --------------------------------

def _layer0_kernel(a_ref, x_ref, w_ref, b_ref, *rest,
                   with_classifier, tm, h_pad):
    """Layer 0: comb = (A@x) @ (conv_w @ comb_wo) + x @ comb_wx + b ; h = relu."""
    if with_classifier:
        cls_w_ref, cls_b_ref, h_ref, aggx_ref, y_ref = rest
    else:
        h_ref, aggx_ref = rest

    row0 = pl.multiple_of(pl.program_id(0) * tm, tm)
    a = a_ref[...]                                       # (TM, N)     bf16
    x_full = x_ref[...]                                  # (N, F_pad)  bf16 (resident)

    # Hoisted skip-connection aggregate for this row tile: A @ x  (reused later).
    agg_x = jnp.dot(a, x_full, preferred_element_type=jnp.float32)
    agg_x_bf = agg_x.astype(jnp.bfloat16)
    x_tile = x_ref[pl.ds(row0, tm), :]                   # ego rows of this tile

    acc = jnp.dot(agg_x_bf, w_ref[:, 0:h_pad],
                  preferred_element_type=jnp.float32)
    acc = acc + jnp.dot(x_tile, w_ref[:, h_pad:2 * h_pad],
                        preferred_element_type=jnp.float32)
    h = jnp.maximum(acc + b_ref[...], 0.0)               # ReLU; dropout = identity

    h_ref[...] = h.astype(h_ref.dtype)                   # lane-dense (TM, H_pad)
    aggx_ref[...] = agg_x_bf

    if with_classifier:
        y_ref[...] = (jnp.dot(h.astype(jnp.bfloat16), cls_w_ref[...],
                              preferred_element_type=jnp.float32)
                      + cls_b_ref[...])


def _layer_kernel(a_ref, hprev_ref, aggx_ref, x_ref, wh_ref, wx_ref, b_ref, *rest,
                  with_classifier, tm, h_pad):
    """Layer i>0 (skip connections + concat ego/neigh, all folded):
       comb = (A@h) @ (conv_wh@comb_wo) + h @ comb_wh
            + (A@x) @ (conv_wx@comb_wo) + x @ comb_wx + b ;  h_next = relu(comb)."""
    if with_classifier:
        cls_w_ref, cls_b_ref, h_ref, y_ref = rest
    else:
        (h_ref,) = rest

    row0 = pl.multiple_of(pl.program_id(0) * tm, tm)
    a = a_ref[...]                                       # (TM, N)      bf16
    hprev_full = hprev_ref[...]                          # (N, H_pad)   bf16 (resident)

    agg_h = jnp.dot(a, hprev_full, preferred_element_type=jnp.float32)
    agg_h_bf = agg_h.astype(jnp.bfloat16)
    hprev_tile = hprev_ref[pl.ds(row0, tm), :]

    acc = jnp.dot(agg_h_bf, wh_ref[:, 0:h_pad],
                  preferred_element_type=jnp.float32)
    acc = acc + jnp.dot(hprev_tile, wh_ref[:, h_pad:2 * h_pad],
                        preferred_element_type=jnp.float32)
    acc = acc + jnp.dot(aggx_ref[...], wx_ref[:, 0:h_pad],
                        preferred_element_type=jnp.float32)
    acc = acc + jnp.dot(x_ref[...], wx_ref[:, h_pad:2 * h_pad],
                        preferred_element_type=jnp.float32)
    h = jnp.maximum(acc + b_ref[...], 0.0)

    h_ref[...] = h.astype(h_ref.dtype)
    if with_classifier:
        y_ref[...] = (jnp.dot(h.astype(jnp.bfloat16), cls_w_ref[...],
                              preferred_element_type=jnp.float32)
                      + cls_b_ref[...])


# --------------------------- pallas_call wrappers -----------------------------

def _full_spec(arr):
    nd = arr.ndim
    return pl.BlockSpec(arr.shape, lambda i, _nd=nd: (0,) * _nd)


def _layer0_call(a, xb, w0, b0, cls_w, cls_b, *, tm, h_pad, out_pad, with_classifier):
    n, f_pad = xb.shape
    grid = (n // tm,)
    kernel = functools.partial(_layer0_kernel, with_classifier=with_classifier,
                               tm=tm, h_pad=h_pad)
    in_specs = [pl.BlockSpec((tm, n), lambda i: (i, 0)),      # A row tile
                _full_spec(xb), _full_spec(w0), _full_spec(b0)]
    inputs = [a, xb, w0, b0]
    out_shapes = [jax.ShapeDtypeStruct((n, h_pad), jnp.bfloat16),
                  jax.ShapeDtypeStruct((n, f_pad), jnp.bfloat16)]
    out_specs = [pl.BlockSpec((tm, h_pad), lambda i: (i, 0)),
                 pl.BlockSpec((tm, f_pad), lambda i: (i, 0))]
    if with_classifier:
        in_specs += [_full_spec(cls_w), _full_spec(cls_b)]
        inputs += [cls_w, cls_b]
        out_shapes.append(jax.ShapeDtypeStruct((n, out_pad), jnp.float32))
        out_specs.append(pl.BlockSpec((tm, out_pad), lambda i: (i, 0)))
    return pl.pallas_call(
        kernel,
        out_shape=tuple(out_shapes),
        grid=grid,
        in_specs=in_specs,
        out_specs=tuple(out_specs),
        compiler_params=_compiler_params(tm, n, f_pad, h_pad, out_pad),
    )(*inputs)


def _layer_call(a, h_prev, agg_x, xb, wh, wx, b, cls_w, cls_b, *,
                tm, h_pad, out_pad, with_classifier):
    n, f_pad = xb.shape
    grid = (n // tm,)
    kernel = functools.partial(_layer_kernel, with_classifier=with_classifier,
                               tm=tm, h_pad=h_pad)
    in_specs = [pl.BlockSpec((tm, n), lambda i: (i, 0)),      # A row tile
                _full_spec(h_prev),                           # full h_prev (resident)
                pl.BlockSpec((tm, f_pad), lambda i: (i, 0)),  # agg_x rows of tile
                pl.BlockSpec((tm, f_pad), lambda i: (i, 0)),  # x rows of tile
                _full_spec(wh), _full_spec(wx), _full_spec(b)]
    inputs = [a, h_prev, agg_x, xb, wh, wx, b]
    out_shapes = [jax.ShapeDtypeStruct((n, h_pad), jnp.bfloat16)]
    out_specs = [pl.BlockSpec((tm, h_pad), lambda i: (i, 0))]
    if with_classifier:
        in_specs += [_full_spec(cls_w), _full_spec(cls_b)]
        inputs += [cls_w, cls_b]
        out_shapes.append(jax.ShapeDtypeStruct((n, out_pad), jnp.float32))
        out_specs.append(pl.BlockSpec((tm, out_pad), lambda i: (i, 0)))
    return pl.pallas_call(
        kernel,
        out_shape=tuple(out_shapes),
        grid=grid,
        in_specs=in_specs,
        out_specs=tuple(out_specs),
        compiler_params=_compiler_params(tm, n, f_pad, h_pad, out_pad),
    )(*inputs)


# ------------------------------ JAX glue --------------------------------------

def build_norm_adj(edge_index, n):
    """Dense GCN-normalized adjacency with (remaining) self loops, f32."""
    src, dst = edge_index[0], edge_index[1]
    a = jnp.zeros((n, n), jnp.float32).at[dst, src].set(1.0)
    eye = jnp.eye(n, dtype=jnp.float32)
    a = a * (1.0 - eye) + eye              # add_remaining_self_loops (diag = 1)
    deg = a.sum(axis=1)
    d_inv_sqrt = 1.0 / jnp.sqrt(jnp.maximum(deg, 1.0))
    return a * d_inv_sqrt[:, None] * d_inv_sqrt[None, :]


def linear_init(key, fan_in, fan_out):
    """Deterministic PyTorch-nn.Linear-style init."""
    k_w, k_b = jax.random.split(key)
    bound = 1.0 / math.sqrt(fan_in)
    w = jax.random.uniform(k_w, (fan_in, fan_out), jnp.float32, -bound, bound)
    b = jax.random.uniform(k_b, (fan_out,), jnp.float32, -bound, bound)
    return w, b


def init_base_gnn_params(key, n_layers, num_in, num_hidden, num_out):
    """Mirrors BaseGNN.__init__ (skip_connections=True, concat_ego_neigh_embs=True,
    share_layer=False)."""
    params = {"layers": []}
    in_size = num_in
    for i in range(n_layers):
        if i > 0:                                       # skip_connections
            in_size += num_in
        key, k_conv, k_comb = jax.random.split(key, 3)
        conv_w, conv_b = linear_init(k_conv, in_size, num_hidden)      # GCNConv lin
        comb_w, comb_b = linear_init(k_comb, in_size + num_hidden, num_hidden)
        params["layers"].append((conv_w, conv_b, comb_w, comb_b))
        in_size = num_hidden
    key, k_cls = jax.random.split(key)
    params["cls_w"], params["cls_b"] = linear_init(k_cls, in_size, num_out)
    return params


def prepare_fused_params(params, num_in, num_hidden, num_out):
    """Fold conv through the combination Linear, split concat weights, pack them
    lane-wise, zero-pad to 128 output lanes and cast weights to bf16 (done once)."""
    f_pad = _round_up(num_in, SUBLANE)
    h_pad = _round_up(num_hidden, LANE)
    out_pad = _round_up(num_out, LANE)
    layers = []
    for i, (conv_w, conv_b, comb_w, comb_b) in enumerate(params["layers"]):
        conv_w = jnp.asarray(conv_w, jnp.float32)
        conv_b = jnp.asarray(conv_b, jnp.float32)
        comb_w = jnp.asarray(comb_w, jnp.float32)
        comb_b = jnp.asarray(comb_b, jnp.float32)
        if i == 0:
            comb_wx = comb_w[:num_in]                      # ego (x) part
            comb_wo = comb_w[num_in:]                      # conv-output part
            w_ax = conv_w @ comb_wo                        # fold conv -> comb
            b = conv_b @ comb_wo + comb_b
            w0 = jnp.zeros((f_pad, 2 * h_pad), jnp.float32)
            w0 = w0.at[:num_in, :num_hidden].set(w_ax)
            w0 = w0.at[:num_in, h_pad:h_pad + num_hidden].set(comb_wx)
            b0 = jnp.zeros((1, h_pad), jnp.float32).at[0, :num_hidden].set(b)
            layers.append((w0.astype(jnp.bfloat16), b0))
        else:
            # conv input = concat([h_prev (H), x (num_in)])
            # comb input = concat([h_prev (H), x (num_in), conv_out (H)])
            conv_wh = conv_w[:num_hidden]
            conv_wx = conv_w[num_hidden:]
            comb_wh = comb_w[:num_hidden]
            comb_wx = comb_w[num_hidden:num_hidden + num_in]
            comb_wo = comb_w[num_hidden + num_in:]
            w_ah = conv_wh @ comb_wo
            w_ax = conv_wx @ comb_wo
            b = conv_b @ comb_wo + comb_b
            wh = jnp.zeros((h_pad, 2 * h_pad), jnp.float32)
            wh = wh.at[:num_hidden, :num_hidden].set(w_ah)
            wh = wh.at[:num_hidden, h_pad:h_pad + num_hidden].set(comb_wh)
            wx = jnp.zeros((f_pad, 2 * h_pad), jnp.float32)
            wx = wx.at[:num_in, :num_hidden].set(w_ax)
            wx = wx.at[:num_in, h_pad:h_pad + num_hidden].set(comb_wx)
            bi = jnp.zeros((1, h_pad), jnp.float32).at[0, :num_hidden].set(b)
            layers.append((wh.astype(jnp.bfloat16), wx.astype(jnp.bfloat16), bi))
    cls_w = jnp.zeros((h_pad, out_pad), jnp.float32)
    cls_w = cls_w.at[:num_hidden, :num_out].set(
        jnp.asarray(params["cls_w"], jnp.float32))
    cls_b = jnp.zeros((1, out_pad), jnp.float32)
    cls_b = cls_b.at[0, :num_out].set(jnp.asarray(params["cls_b"], jnp.float32))
    return {"layers": layers, "cls": (cls_w.astype(jnp.bfloat16), cls_b)}


@functools.partial(jax.jit,
                   static_argnames=("n_layers", "num_hidden", "num_out", "tm"))
def base_gnn_forward(x, edge_index, prepared, *, n_layers, num_hidden, num_out,
                     tm=None):
    """Eval-mode forward of BaseGNN (dropout == identity) via row-tiled fused
    per-layer Pallas kernels (classifier fused into the last layer)."""
    n = x.shape[0]
    if tm is None:
        tm = _pick_tm(n)

    w0, b0 = prepared["layers"][0]
    cls_w, cls_b = prepared["cls"]
    f_pad = w0.shape[0]
    h_pad = w0.shape[1] // 2
    out_pad = cls_w.shape[1]
    f_in = x.shape[1]

    a = build_norm_adj(edge_index, n).astype(jnp.bfloat16)
    xb = jnp.pad(x, ((0, 0), (0, f_pad - f_in))).astype(jnp.bfloat16)

    outs0 = _layer0_call(a, xb, w0, b0, cls_w, cls_b, tm=tm, h_pad=h_pad,
                         out_pad=out_pad, with_classifier=(n_layers == 1))
    h, agg_x = outs0[0], outs0[1]
    h_list = [h]
    y = outs0[2] if n_layers == 1 else None

    for i in range(1, n_layers):
        wh, wx, b = prepared["layers"][i]
        last = (i == n_layers - 1)
        outs = _layer_call(a, h, agg_x, xb, wh, wx, b, cls_w, cls_b,
                           tm=tm, h_pad=h_pad, out_pad=out_pad,
                           with_classifier=last)
        h = outs[0]
        h_list.append(h)
        if last:
            y = outs[1]

    h_list = [hi[:, :num_hidden].astype(jnp.float32) for hi in h_list]
    y_pred = y[:, :num_out]
    return h_list, [y_pred], [None]        # GCN conv returns no edge weights


def base_gnn_reference(x, edge_index, params):
    """Pure-JAX f32 reference identical to the PyTorch forward (eval mode)."""
    n = x.shape[0]
    a = build_norm_adj(edge_index, n)
    h_list = []
    layer_input = x
    for i, (cw, cb, mw, mb) in enumerate(params["layers"]):
        if i > 0:
            layer_input = jnp.concatenate([layer_input, x], axis=1)
        conv = a @ layer_input @ cw + cb
        comb = jnp.concatenate([layer_input, conv], axis=1) @ mw + mb
        h = jax.nn.relu(comb)
        h_list.append(h)
        layer_input = h
    y = layer_input @ params["cls_w"] + params["cls_b"]
    return h_list, [y], [None]


# ------------------------------ driver -----------------------------------------

if __name__ == "__main__":
    N_NODES = 64
    NUM_IN = 8
    NUM_HIDDEN = 32
    NUM_OUT = 4
    N_LAYERS = 2

    key = jax.random.PRNGKey(0)
    key, k_x = jax.random.split(key)
    x = jax.random.normal(k_x, (N_NODES, NUM_IN), jnp.float32)

    # deterministic ring graph, both directions
    nodes = jnp.arange(N_NODES, dtype=jnp.int32)
    src = jnp.concatenate([nodes, (nodes + 1) % N_NODES])
    dst = jnp.concatenate([(nodes + 1) % N_NODES, nodes])
    edge_index = jnp.stack([src, dst], axis=0)  # (2, E)

    params = init_base_gnn_params(key, N_LAYERS, NUM_IN, NUM_HIDDEN, NUM_OUT)
    prepared = prepare_fused_params(params, NUM_IN, NUM_HIDDEN, NUM_OUT)

    h_list, y_pred_list, e_w_list = base_gnn_forward(
        x, edge_index, prepared,
        n_layers=N_LAYERS, num_hidden=NUM_HIDDEN, num_out=NUM_OUT)
    jax.block_until_ready((h_list, y_pred_list))

    # shape checks
    assert h_list[0].shape == (N_NODES, NUM_HIDDEN)
    assert h_list[1].shape == (N_NODES, NUM_HIDDEN)
    assert y_pred_list[0].shape == (N_NODES, NUM_OUT)
    assert e_w_list == [None]

    # numerical check against the pure-JAX f32 reference (bf16 inputs -> ~1e-2 tol)
    h_ref, y_ref, _ = base_gnn_reference(x, edge_index, params)
    for got, want in zip(h_list + y_pred_list, h_ref + y_ref):
        assert jnp.allclose(got, want, rtol=2e-2, atol=2e-2), \
            float(jnp.max(jnp.abs(got - want)))

    print("KERNEL_OK")
</pallas_src>

<mosaic_0001>
module attributes {stable_mosaic.version = 11 : i64} {
  func.func @_layer_kernel(%arg0: i32, %arg1: memref<64x64xbf16, #tpu.memory_space<vmem>>, %arg2: memref<64x128xbf16, #tpu.memory_space<vmem>>, %arg3: memref<64x8xbf16, #tpu.memory_space<vmem>>, %arg4: memref<64x8xbf16, #tpu.memory_space<vmem>>, %arg5: memref<128x256xbf16, #tpu.memory_space<vmem>>, %arg6: memref<8x256xbf16, #tpu.memory_space<vmem>>, %arg7: memref<1x128xf32, #tpu.memory_space<vmem>>, %arg8: memref<128x128xbf16, #tpu.memory_space<vmem>>, %arg9: memref<1x128xf32, #tpu.memory_space<vmem>>, %arg10: memref<64x128xbf16, #tpu.memory_space<vmem>>, %arg11: memref<64x128xf32, #tpu.memory_space<vmem>>) attributes {dimension_semantics = [#tpu.dimension_semantics<parallel>], iteration_bounds = array<i64: 1>, scalar_prefetch = 0 : i64, scratch_operands = 0 : i64, tpu.core_type = #tpu.core_type<tc>, window_params = [{transform_indices = @transform_0, window_bounds = array<i64: 64, 64>}, {pipeline_mode = #tpu.pipeline_mode<synchronous>, transform_indices = @transform_1, window_bounds = array<i64: 64, 128>}, {transform_indices = @transform_2, window_bounds = array<i64: 64, 8>}, {transform_indices = @transform_3, window_bounds = array<i64: 64, 8>}, {pipeline_mode = #tpu.pipeline_mode<synchronous>, transform_indices = @transform_4, window_bounds = array<i64: 128, 256>}, {pipeline_mode = #tpu.pipeline_mode<synchronous>, transform_indices = @transform_5, window_bounds = array<i64: 8, 256>}, {pipeline_mode = #tpu.pipeline_mode<synchronous>, transform_indices = @transform_6, window_bounds = array<i64: 1, 128>}, {pipeline_mode = #tpu.pipeline_mode<synchronous>, transform_indices = @transform_7, window_bounds = array<i64: 128, 128>}, {pipeline_mode = #tpu.pipeline_mode<synchronous>, transform_indices = @transform_8, window_bounds = array<i64: 1, 128>}, {transform_indices = @transform_9, window_bounds = array<i64: 64, 128>}, {transform_indices = @transform_10, window_bounds = array<i64: 64, 128>}]} {
    %c64_i32 = arith.constant 64 : i32
    %0 = arith.muli %arg0, %c64_i32 : i32
    %1 = tpu.assume_multiple %0, 64 : i32
    %c0 = arith.constant 0 : index
    %c0_0 = arith.constant 0 : index
    %2 = vector.load %arg1[%c0, %c0_0] : memref<64x64xbf16, #tpu.memory_space<vmem>>, vector<64x64xbf16>
    %c0_1 = arith.constant 0 : index
    %c0_2 = arith.constant 0 : index
    %3 = vector.load %arg2[%c0_1, %c0_2] : memref<64x128xbf16, #tpu.memory_space<vmem>>, vector<64x128xbf16>
    %cst = arith.constant dense<0.000000e+00> : vector<64x128xf32>
    %4 = tpu.matmul %2, %3, %cst {dimension_numbers = #tpu.dot_dimension_numbers<[1], [0], [0], [1], [0, 0, 1, 1], [], []>} : vector<64x64xbf16>, vector<64x128xbf16>, vector<64x128xf32> -> vector<64x128xf32>
    %5 = arith.truncf %4 : vector<64x128xf32> to vector<64x128xbf16>
    %6 = arith.index_cast %1 : i32 to index
    %c0_3 = arith.constant 0 : index
    %7 = vector.load %arg2[%6, %c0_3] : memref<64x128xbf16, #tpu.memory_space<vmem>>, vector<64x128xbf16>
    %c0_4 = arith.constant 0 : index
    %c0_5 = arith.constant 0 : index
    %8 = vector.load %arg5[%c0_4, %c0_5] : memref<128x256xbf16, #tpu.memory_space<vmem>>, vector<128x128xbf16>
    %cst_6 = arith.constant dense<0.000000e+00> : vector<64x128xf32>
    %9 = tpu.matmul %5, %8, %cst_6 {dimension_numbers = #tpu.dot_dimension_numbers<[1], [0], [0], [1], [0, 0, 1, 1], [], []>} : vector<64x128xbf16>, vector<128x128xbf16>, vector<64x128xf32> -> vector<64x128xf32>
    %c0_7 = arith.constant 0 : index
    %c128 = arith.constant 128 : index
    %10 = vector.load %arg5[%c0_7, %c128] : memref<128x256xbf16, #tpu.memory_space<vmem>>, vector<128x128xbf16>
    %cst_8 = arith.constant dense<0.000000e+00> : vector<64x128xf32>
    %11 = tpu.matmul %7, %10, %cst_8 {dimension_numbers = #tpu.dot_dimension_numbers<[1], [0], [0], [1], [0, 0, 1, 1], [], []>} : vector<64x128xbf16>, vector<128x128xbf16>, vector<64x128xf32> -> vector<64x128xf32>
    %12 = arith.addf %9, %11 : vector<64x128xf32>
    %c0_9 = arith.constant 0 : index
    %c0_10 = arith.constant 0 : index
    %13 = vector.load %arg3[%c0_9, %c0_10] : memref<64x8xbf16, #tpu.memory_space<vmem>>, vector<64x8xbf16>
    %c0_11 = arith.constant 0 : index
    %c0_12 = arith.constant 0 : index
    %14 = vector.load %arg6[%c0_11, %c0_12] : memref<8x256xbf16, #tpu.memory_space<vmem>>, vector<8x128xbf16>
    %cst_13 = arith.constant dense<0.000000e+00> : vector<64x128xf32>
    %15 = tpu.matmul %13, %14, %cst_13 {dimension_numbers = #tpu.dot_dimension_numbers<[1], [0], [0], [1], [0, 0, 1, 1], [], []>} : vector<64x8xbf16>, vector<8x128xbf16>, vector<64x128xf32> -> vector<64x128xf32>
    %16 = arith.addf %12, %15 : vector<64x128xf32>
    %c0_14 = arith.constant 0 : index
    %c0_15 = arith.constant 0 : index
    %17 = vector.load %arg4[%c0_14, %c0_15] : memref<64x8xbf16, #tpu.memory_space<vmem>>, vector<64x8xbf16>
    %c0_16 = arith.constant 0 : index
    %c128_17 = arith.constant 128 : index
    %18 = vector.load %arg6[%c0_16, %c128_17] : memref<8x256xbf16, #tpu.memory_space<vmem>>, vector<8x128xbf16>
    %cst_18 = arith.constant dense<0.000000e+00> : vector<64x128xf32>
    %19 = tpu.matmul %17, %18, %cst_18 {dimension_numbers = #tpu.dot_dimension_numbers<[1], [0], [0], [1], [0, 0, 1, 1], [], []>} : vector<64x8xbf16>, vector<8x128xbf16>, vector<64x128xf32> -> vector<64x128xf32>
    %20 = arith.addf %16, %19 : vector<64x128xf32>
    %c0_19 = arith.constant 0 : index
    %c0_20 = arith.constant 0 : index
    %21 = vector.load %arg7[%c0_19, %c0_20] : memref<1x128xf32, #tpu.memory_space<vmem>>, vector<1x128xf32>
    %22 = vector.broadcast %21 : vector<1x128xf32> to vector<64x128xf32>
    %23 = arith.addf %20, %22 : vector<64x128xf32>
    %cst_21 = arith.constant 0.000000e+00 : f32
    %24 = vector.broadcast %cst_21 : f32 to vector<64x128xf32>
    %25 = arith.maximumf %23, %24 : vector<64x128xf32>
    %26 = arith.truncf %25 : vector<64x128xf32> to vector<64x128xbf16>
    %c0_22 = arith.constant 0 : index
    %c0_23 = arith.constant 0 : index
    %27 = vector.load %arg10[%c0_22, %c0_23] : memref<64x128xbf16, #tpu.memory_space<vmem>>, vector<64x128xbf16>
    tpu.vector_store %arg10[%c0_22, %c0_23], %26 {strides = array<i32>} : memref<64x128xbf16, #tpu.memory_space<vmem>>, vector<64x128xbf16>,
    %28 = arith.truncf %25 : vector<64x128xf32> to vector<64x128xbf16>
    %c0_24 = arith.constant 0 : index
    %c0_25 = arith.constant 0 : index
    %29 = vector.load %arg8[%c0_24, %c0_25] : memref<128x128xbf16, #tpu.memory_space<vmem>>, vector<128x128xbf16>
    %cst_26 = arith.constant dense<0.000000e+00> : vector<64x128xf32>
    %30 = tpu.matmul %28, %29, %cst_26 {dimension_numbers = #tpu.dot_dimension_numbers<[1], [0], [0], [1], [0, 0, 1, 1], [], []>} : vector<64x128xbf16>, vector<128x128xbf16>, vector<64x128xf32> -> vector<64x128xf32>
    %c0_27 = arith.constant 0 : index
    %c0_28 = arith.constant 0 : index
    %31 = vector.load %arg9[%c0_27, %c0_28] : memref<1x128xf32, #tpu.memory_space<vmem>>, vector<1x128xf32>
    %32 = vector.broadcast %31 : vector<1x128xf32> to vector<64x128xf32>
    %33 = arith.addf %30, %32 : vector<64x128xf32>
    %c0_29 = arith.constant 0 : index
    %c0_30 = arith.constant 0 : index
    %34 = vector.load %arg11[%c0_29, %c0_30] : memref<64x128xf32, #tpu.memory_space<vmem>>, vector<64x128xf32>
    tpu.vector_store %arg11[%c0_29, %c0_30], %33 {strides = array<i32>} : memref<64x128xf32, #tpu.memory_space<vmem>>, vector<64x128xf32>,
    return
  }
  func.func @transform_0(%arg0: i32) -> (i32, i32) {
    %c0_i32 = arith.constant 0 : i32
    %c0_i32_0 = arith.constant 0 : i32
    return %arg0, %c0_i32 : i32, i32
  }
  func.func @transform_1(%arg0: i32) -> (i32, i32) {
    %c0_i32 = arith.constant 0 : i32
    %c0_i32_0 = arith.constant 0 : i32
    %c0_i32_1 = arith.constant 0 : i32
    return %c0_i32, %c0_i32_0 : i32, i32
  }
  func.func @transform_2(%arg0: i32) -> (i32, i32) {
    %c0_i32 = arith.constant 0 : i32
    %c0_i32_0 = arith.constant 0 : i32
    return %arg0, %c0_i32 : i32, i32
  }
  func.func @transform_3(%arg0: i32) -> (i32, i32) {
    %c0_i32 = arith.constant 0 : i32
    %c0_i32_0 = arith.constant 0 : i32
    return %arg0, %c0_i32 : i32, i32
  }
  func.func @transform_4(%arg0: i32) -> (i32, i32) {
    %c0_i32 = arith.constant 0 : i32
    %c0_i32_0 = arith.constant 0 : i32
    %c0_i32_1 = arith.constant 0 : i32
    return %c0_i32, %c0_i32_0 : i32, i32
  }
  func.func @transform_5(%arg0: i32) -> (i32, i32) {
    %c0_i32 = arith.constant 0 : i32
    %c0_i32_0 = arith.constant 0 : i32
    %c0_i32_1 = arith.constant 0 : i32
    return %c0_i32, %c0_i32_0 : i32, i32
  }
  func.func @transform_6(%arg0: i32) -> (i32, i32) {
    %c0_i32 = arith.constant 0 : i32
    %c0_i32_0 = arith.constant 0 : i32
    %c0_i32_1 = arith.constant 0 : i32
    return %c0_i32, %c0_i32_0 : i32, i32
  }
  func.func @transform_7(%arg0: i32) -> (i32, i32) {
    %c0_i32 = arith.constant 0 : i32
    %c0_i32_0 = arith.constant 0 : i32
    %c0_i32_1 = arith.constant 0 : i32
    return %c0_i32, %c0_i32_0 : i32, i32
  }
  func.func @transform_8(%arg0: i32) -> (i32, i32) {
    %c0_i32 = arith.constant 0 : i32
    %c0_i32_0 = arith.constant 0 : i32
    %c0_i32_1 = arith.constant 0 : i32
    return %c0_i32, %c0_i32_0 : i32, i32
  }
  func.func @transform_9(%arg0: i32) -> (i32, i32) {
    %c0_i32 = arith.constant 0 : i32
    %c0_i32_0 = arith.constant 0 : i32
    return %arg0, %c0_i32 : i32, i32
  }
  func.func @transform_10(%arg0: i32) -> (i32, i32) {
    %c0_i32 = arith.constant 0 : i32
    %c0_i32_0 = arith.constant 0 : i32
    return %arg0, %c0_i32 : i32, i32
  }
}

module attributes {stable_mosaic.version = 11 : i64} {
  func.func @_layer0_kernel(%arg0: i32, %arg1: memref<64x64xbf16, #tpu.memory_space<vmem>>, %arg2: memref<64x8xbf16, #tpu.memory_space<vmem>>, %arg3: memref<8x256xbf16, #tpu.memory_space<vmem>>, %arg4: memref<1x128xf32, #tpu.memory_space<vmem>>, %arg5: memref<64x128xbf16, #tpu.memory_space<vmem>>, %arg6: memref<64x8xbf16, #tpu.memory_space<vmem>>) attributes {dimension_semantics = [#tpu.dimension_semantics<parallel>], iteration_bounds = array<i64: 1>, scalar_prefetch = 0 : i64, scratch_operands = 0 : i64, tpu.core_type = #tpu.core_type<tc>, window_params = [{transform_indices = @transform_0, window_bounds = array<i64: 64, 64>}, {pipeline_mode = #tpu.pipeline_mode<synchronous>, transform_indices = @transform_1, window_bounds = array<i64: 64, 8>}, {pipeline_mode = #tpu.pipeline_mode<synchronous>, transform_indices = @transform_2, window_bounds = array<i64: 8, 256>}, {pipeline_mode = #tpu.pipeline_mode<synchronous>, transform_indices = @transform_3, window_bounds = array<i64: 1, 128>}, {transform_indices = @transform_4, window_bounds = array<i64: 64, 128>}, {transform_indices = @transform_5, window_bounds = array<i64: 64, 8>}]} {
    %c64_i32 = arith.constant 64 : i32
    %0 = arith.muli %arg0, %c64_i32 : i32
    %1 = tpu.assume_multiple %0, 64 : i32
    %c0 = arith.constant 0 : index
    %c0_0 = arith.constant 0 : index
    %2 = vector.load %arg1[%c0, %c0_0] : memref<64x64xbf16, #tpu.memory_space<vmem>>, vector<64x64xbf16>
    %c0_1 = arith.constant 0 : index
    %c0_2 = arith.constant 0 : index
    %3 = vector.load %arg2[%c0_1, %c0_2] : memref<64x8xbf16, #tpu.memory_space<vmem>>, vector<64x8xbf16>
    %cst = arith.constant dense<0.000000e+00> : vector<64x8xf32>
    %4 = tpu.matmul %2, %3, %cst {dimension_numbers = #tpu.dot_dimension_numbers<[1], [0], [0], [1], [0, 0, 1, 1], [], []>} : vector<64x64xbf16>, vector<64x8xbf16>, vector<64x8xf32> -> vector<64x8xf32>
    %5 = arith.truncf %4 : vector<64x8xf32> to vector<64x8xbf16>
    %6 = arith.index_cast %1 : i32 to index
    %c0_3 = arith.constant 0 : index
    %7 = vector.load %arg2[%6, %c0_3] : memref<64x8xbf16, #tpu.memory_space<vmem>>, vector<64x8xbf16>
    %c0_4 = arith.constant 0 : index
    %c0_5 = arith.constant 0 : index
    %8 = vector.load %arg3[%c0_4, %c0_5] : memref<8x256xbf16, #tpu.memory_space<vmem>>, vector<8x128xbf16>
    %cst_6 = arith.constant dense<0.000000e+00> : vector<64x128xf32>
    %9 = tpu.matmul %5, %8, %cst_6 {dimension_numbers = #tpu.dot_dimension_numbers<[1], [0], [0], [1], [0, 0, 1, 1], [], []>} : vector<64x8xbf16>, vector<8x128xbf16>, vector<64x128xf32> -> vector<64x128xf32>
    %c0_7 = arith.constant 0 : index
    %c128 = arith.constant 128 : index
    %10 = vector.load %arg3[%c0_7, %c128] : memref<8x256xbf16, #tpu.memory_space<vmem>>, vector<8x128xbf16>
    %cst_8 = arith.constant dense<0.000000e+00> : vector<64x128xf32>
    %11 = tpu.matmul %7, %10, %cst_8 {dimension_numbers = #tpu.dot_dimension_numbers<[1], [0], [0], [1], [0, 0, 1, 1], [], []>} : vector<64x8xbf16>, vector<8x128xbf16>, vector<64x128xf32> -> vector<64x128xf32>
    %12 = arith.addf %9, %11 : vector<64x128xf32>
    %c0_9 = arith.constant 0 : index
    %c0_10 = arith.constant 0 : index
    %13 = vector.load %arg4[%c0_9, %c0_10] : memref<1x128xf32, #tpu.memory_space<vmem>>, vector<1x128xf32>
    %14 = vector.broadcast %13 : vector<1x128xf32> to vector<64x128xf32>
    %15 = arith.addf %12, %14 : vector<64x128xf32>
    %cst_11 = arith.constant 0.000000e+00 : f32
    %16 = vector.broadcast %cst_11 : f32 to vector<64x128xf32>
    %17 = arith.maximumf %15, %16 : vector<64x128xf32>
    %18 = arith.truncf %17 : vector<64x128xf32> to vector<64x128xbf16>
    %c0_12 = arith.constant 0 : index
    %c0_13 = arith.constant 0 : index
    %19 = vector.load %arg5[%c0_12, %c0_13] : memref<64x128xbf16, #tpu.memory_space<vmem>>, vector<64x128xbf16>
    tpu.vector_store %arg5[%c0_12, %c0_13], %18 {strides = array<i32>} : memref<64x128xbf16, #tpu.memory_space<vmem>>, vector<64x128xbf16>,
    %c0_14 = arith.constant 0 : index
    %c0_15 = arith.constant 0 : index
    %20 = vector.load %arg6[%c0_14, %c0_15] : memref<64x8xbf16, #tpu.memory_space<vmem>>, vector<64x8xbf16>
    tpu.vector_store %arg6[%c0_14, %c0_15], %5 {strides = array<i32>} : memref<64x8xbf16, #tpu.memory_space<vmem>>, vector<64x8xbf16>,
    return
  }
  func.func @transform_0(%arg0: i32) -> (i32, i32) {
    %c0_i32 = arith.constant 0 : i32
    %c0_i32_0 = arith.constant 0 : i32
    return %arg0, %c0_i32 : i32, i32
  }
  func.func @transform_1(%arg0: i32) -> (i32, i32) {
    %c0_i32 = arith.constant 0 : i32
    %c0_i32_0 = arith.constant 0 : i32
    %c0_i32_1 = arith.constant 0 : i32
    return %c0_i32, %c0_i32_0 : i32, i32
  }
  func.func @transform_2(%arg0: i32) -> (i32, i32) {
    %c0_i32 = arith.constant 0 : i32
    %c0_i32_0 = arith.constant 0 : i32
    %c0_i32_1 = arith.constant 0 : i32
    return %c0_i32, %c0_i32_0 : i32, i32
  }
  func.func @transform_3(%arg0: i32) -> (i32, i32) {
    %c0_i32 = arith.constant 0 : i32
    %c0_i32_0 = arith.constant 0 : i32
    %c0_i32_1 = arith.constant 0 : i32
    return %c0_i32, %c0_i32_0 : i32, i32
  }
  func.func @transform_4(%arg0: i32) -> (i32, i32) {
    %c0_i32 = arith.constant 0 : i32
    %c0_i32_0 = arith.constant 0 : i32
    return %arg0, %c0_i32 : i32, i32
  }
  func.func @transform_5(%arg0: i32) -> (i32, i32) {
    %c0_i32 = arith.constant 0 : i32
    %c0_i32_0 = arith.constant 0 : i32
    return %arg0, %c0_i32 : i32, i32
  }
}

</mosaic_0001>

<bundles_post_ra>
// kernel: base_gnn_forward.2
= control target key start
LH: loop header
LB: loop body
LE: loop exit
PB: predicated region body
PF: predicated region fallthrough
CT: control target
= control target key end

     0   :  { %vm81_vm0 = vcmask 523264   ;;  %vm210_vm1 = vcmask 1043456   ;;  %vm197_vm2 = vcmask 64512   ;;  %vm450_vm3 = vcmask 60416   ;;  %s752_s1 = inlined_call_operand.vmem [shape: bf16[64,8], index: 1, kind: input, shape index: {}]   ;;  %s753_s0 = inlined_call_operand.vmem [shape: bf16[64,64], index: 0, kind: input, shape index: {}]   ;;  %s754_s2 = inlined_call_operand.vmem [shape: bf16[8,256], index: 2, kind: input, shape index: {}]   ;;  %s755_s5 = inlined_call_operand.vmem [shape: bf16[64,8], index: 5, kind: output, shape index: {1}]   ;;  %s756_s3 = inlined_call_operand.vmem [shape: f32[1,128], index: 3, kind: input, shape index: {}]   ;;  %s757_s4 = inlined_call_operand.vmem [shape: bf16[64,128], index: 4, kind: output, shape index: {0}]  }
   0x1   :  { %v605_v0 = vld [vmem:[%s752_s1 + $0x18] sm:$0xff]   ;;  %v606_v1 = vld [vmem:[%s752_s1 + $0x10] sm:$0xff]   ;;  %v607_v2 = vld [vmem:[%s752_s1 + $0x8] sm:$0xff]  }
   0x2   :  { %567 = vmatprep.subr.bf16.mxu0 %v605_v0  ;;  %v609_v3 = vld [vmem:[%s753_s0] sm:$0xff]   ;;  %v614_v9 = vld [vmem:[%s752_s1 + $0x8] sm:$0xff]   ;;  %v615_v11 = vld [vmem:[%s752_s1 + $0x10] sm:$0xff]  }
   0x3   :  { %568 = vmatpush3.bf16.msra.mxu0 %v605_v0  ;;  %575 = vmatprep.mubr.msk.bf16.mxu0 %vm81_vm0, %v609_v3  ;;  %v608_v4 = vld [vmem:[%s752_s1] sm:$0xff]   ;;  %v610_v12 = vld [vmem:[%s753_s0 + $0x8] sm:$0xff]   ;;  %v611_v13 = vld [vmem:[%s753_s0 + $0x10] sm:$0xff]  }
   0x4   :  { %569 = vmatprep.subr.bf16.mxu0 %v606_v1  ;;  %v175_v5 = vld [vmem:[%s754_s2] sm:$0xf]  ;;  %v176_v6 = vld [vmem:[%s754_s2 + $0x4] sm:$0xf]  ;;  %v616_v14 = vld [vmem:[%s752_s1 + $0x18] sm:$0xff]  }
   0x5   :  { %603 = vmatprep.subr.msk.bf16.mxu1 %vm210_vm1, %v176_v6  ;;  %v212_v7 = vsel %vm210_vm1, %v176_v6, 0  ;;  %v613_v8 = vld [vmem:[%s752_s1] sm:$0xff]   ;;  %v292_v10 = vsel %vm210_vm1, %v175_v5, 0  ;;  %v612_v15 = vld [vmem:[%s753_s0 + $0x18] sm:$0xff]  }
   0x6   :  { %584 = vmatpush3.bf16.msra.mxu1 %v212_v7  ;;  %585 = vmatprep.mubr.msk.bf16.mxu1 %vm197_vm2, %v613_v8  ;;  %v493_v46 = vld [vmem:[%s756_s3] ss:$0 sm:$0xff] }
   0x7   :  { %570 = vmatpush3.bf16.msra.mxu0 %v606_v1  ;;  %604 = vmatprep.subr.msk.bf16.mxu1 %vm210_vm1, %v175_v5 }
   0x8   :  { %571 = vmatprep.subr.bf16.mxu0 %v607_v2 }
   0x9   :  { %586 = vmatmul.mubr.msk.bf16.vlgmr.msra.gmra.mxu1 %vm197_vm2, %v614_v9 }
   0xa   :  { %594 = vmatpush3.bf16.msra.mxu1 %v292_v10  ;;  %589 = vmatprep.mubr.msk.bf16.mxu1 %vm197_vm2, %v615_v11 }
   0xb   :  { %572 = vmatpush3.bf16.msra.mxu0 %v607_v2 }
   0xc   :  { %573 = vmatprep.subr.bf16.mxu0 %v608_v4 }
   0xf   :  { %574 = vmatpush3.bf16.msra.mxu0 %v608_v4 }
  0x11   :  { %590 = vmatmul.mubr.msk.bf16.gmra.mxu1 %vm197_vm2, %v616_v14 }
  0x12   :  { %576 = vmatmul.mubr.msk.bf16.vlgmr.msra.gmra.mxu0 %vm81_vm0, %v610_v12 }
  0x13   :  { %579 = vmatprep.mubr.msk.bf16.mxu0 %vm81_vm0, %v611_v13 }
  0x1a   :  { %580 = vmatmul.mubr.msk.bf16.gmra.mxu0 %vm81_vm0, %v612_v15 }
  0xc9   :  { %v587_v36 = vpop.f32.mrf.mxu1 }
  0xcb   :  { %v248_v37 = vpop.f32.mrf.mxu1 }
  0xcd   :  { %v588_v38 = vpop.f32.mrf.mxu1 }
  0xcf   :  { %v251_v39 = vpop.f32.mrf.mxu1 }
  0xd1   :  { %v591_v40 = vpop.f32.mrf.mxu1 }
  0xd2   :  { %v577_v16 = vpop.f32.mrf.mxu0 }
  0xd3   :  { %v520_v17 = vpack.c.bf16 %v577_v16, %v577_v16  ;;  %v264_v41 = vpop.f32.mrf.mxu1 }
  0xd4   :  { %v128_v18 = vpop.f32.mrf.mxu0 }
  0xd5   :  { %453 = vst.msk [vmem:[%s755_s5 + $0x8] sm:$0xf] %vm450_vm3, %v520_v17  ;;  %v518_v19 = vpack.c.bf16 %v128_v18, %v128_v18  ;;  %v592_v42 = vpop.f32.mrf.mxu1 }
  0xd6   :  { %v578_v20 = vpop.f32.mrf.mxu0 }
  0xd7   :  { %451 = vst.msk [vmem:[%s755_s5] sm:$0xf] %vm450_vm3, %v518_v19  ;;  %v521_v21 = vpack.c.bf16 %v578_v20, %v578_v20  ;;  %v160_v25 = vpack.c.bf16 %v578_v20, %v577_v16  ;;  %v267_v43 = vpop.f32.mrf.mxu1 }
  0xd8   :  { %v131_v22 = vpop.f32.mrf.mxu0 }
  0xd9   :  { %454 = vst.msk [vmem:[%s755_s5 + $0xc] sm:$0xf] %vm450_vm3, %v521_v21  ;;  %v159_v23 = vpack.c.bf16 %v131_v22, %v128_v18  ;;  %v519_v24 = vpack.c.bf16 %v131_v22, %v131_v22 }
  0xda   :  { %v581_v26 = vpop.f32.mrf.mxu0 }
  0xdb   :  { %452 = vst.msk [vmem:[%s755_s5 + $0x4] sm:$0xf] %vm450_vm3, %v519_v24  ;;  %v524_v27 = vpack.c.bf16 %v581_v26, %v581_v26  ;;  %595 = vmatprep.mubr.msk.bf16.mxu1 %vm197_vm2, %v159_v23 }
  0xdc   :  { %v144_v28 = vpop.f32.mrf.mxu0  ;;  %596 = vmatmul.mubr.msk.bf16.vlgmr.msra.gmra.mxu1 %vm197_vm2, %v160_v25 }
  0xdd   :  { %457 = vst.msk [vmem:[%s755_s5 + $0x18] sm:$0xf] %vm450_vm3, %v524_v27  ;;  %v522_v29 = vpack.c.bf16 %v144_v28, %v144_v28 }
  0xde   :  { %v582_v30 = vpop.f32.mrf.mxu0 }
  0xdf   :  { %455 = vst.msk [vmem:[%s755_s5 + $0x10] sm:$0xf] %vm450_vm3, %v522_v29  ;;  %v525_v31 = vpack.c.bf16 %v582_v30, %v582_v30  ;;  %v162_v35 = vpack.c.bf16 %v582_v30, %v581_v26 }
  0xe0   :  { %v147_v32 = vpop.f32.mrf.mxu0 }
  0xe1   :  { %458 = vst.msk [vmem:[%s755_s5 + $0x1c] sm:$0xf] %vm450_vm3, %v525_v31  ;;  %v161_v33 = vpack.c.bf16 %v147_v32, %v144_v28  ;;  %v523_v34 = vpack.c.bf16 %v147_v32, %v147_v32 }
  0xe3   :  { %456 = vst.msk [vmem:[%s755_s5 + $0x14] sm:$0xf] %vm450_vm3, %v523_v34  ;;  %599 = vmatprep.mubr.msk.bf16.mxu1 %vm197_vm2, %v161_v33 }
  0xe4   :  { %600 = vmatmul.mubr.msk.bf16.gmra.mxu1 %vm197_vm2, %v162_v35 }
 0x19c   :  { %v597_v44 = vpop.f32.mrf.mxu1 }
 0x19d   :  { %v337_v45 = vadd.f32 %v597_v44, %v587_v36 }
 0x19e   :  { %v328_v47 = vpop.f32.mrf.mxu1 }
 0x19f   :  { %v329_v48 = vadd.f32 %v328_v47, %v248_v37  ;;  %v368_v50 = vadd.f32 %v493_v46, %v337_v45 }
 0x1a0   :  { %v598_v49 = vpop.f32.mrf.mxu1 }
 0x1a1   :  { %v340_v51 = vadd.f32 %v598_v49, %v588_v38  ;;  %v366_v53 = vadd.f32 %v493_v46, %v329_v48  ;;  %v376_v57 = vmax.f32 %v368_v50, 0.0 }
 0x1a2   :  { %v331_v52 = vpop.f32.mrf.mxu1 }
 0x1a3   :  { %v369_v54 = vadd.f32 %v493_v46, %v340_v51  ;;  %v332_v55 = vadd.f32 %v331_v52, %v251_v39  ;;  %v374_v62 = vmax.f32 %v366_v53, 0.0 }
 0x1a4   :  { %v601_v56 = vpop.f32.mrf.mxu1 }
 0x1a5   :  { %v377_v58 = vmax.f32 %v369_v54, 0.0  ;;  %v367_v59 = vadd.f32 %v493_v46, %v332_v55  ;;  %v353_v60 = vadd.f32 %v601_v56, %v591_v40 }
 0x1a6   :  { %v344_v61 = vpop.f32.mrf.mxu1 }
 0x1a7   :  { %v534_v63 = vpack.c.bf16 %v377_v58, %v376_v57  ;;  %v375_v0 = vmax.f32 %v367_v59, 0.0  ;;  %v345_v1 = vadd.f32 %v344_v61, %v264_v41  ;;  %v372_v4 = vadd.f32 %v493_v46, %v353_v60 }
 0x1a8   :  { %v602_v2 = vpop.f32.mrf.mxu1 }
 0x1a9   :  { %546 = vst [vmem:[%s757_s4 + $0x8] sm:$0xff] %v534_v63   ;;  %v529_v3 = vpack.c.bf16 %v375_v0, %v374_v62  ;;  %v356_v5 = vadd.f32 %v602_v2, %v592_v42  ;;  %v370_v7 = vadd.f32 %v493_v46, %v345_v1  ;;  %v380_v10 = vmax.f32 %v372_v4, 0.0 }
 0x1aa   :  { %v347_v6 = vpop.f32.mrf.mxu1 }
 0x1ab   :  { %530 = vst [vmem:[%s757_s4] sm:$0xff] %v529_v3   ;;  %v373_v8 = vadd.f32 %v493_v46, %v356_v5  ;;  %v348_v9 = vadd.f32 %v347_v6, %v267_v43  ;;  %v378_v13 = vmax.f32 %v370_v7, 0.0 }
 0x1ad   :  { %v381_v11 = vmax.f32 %v373_v8, 0.0  ;;  %v371_v12 = vadd.f32 %v493_v46, %v348_v9 }
 0x1af   :  { %v544_v14 = vpack.c.bf16 %v381_v11, %v380_v10  ;;  %v379_v15 = vmax.f32 %v371_v12, 0.0 }
 0x1b1   :  { %548 = vst [vmem:[%s757_s4 + $0x18] sm:$0xff] %v544_v14   ;;  %v539_v16 = vpack.c.bf16 %v379_v15, %v378_v13 }
 0x1b3   :  { %547 = vst [vmem:[%s757_s4 + $0x10] sm:$0xff] %v539_v16  }

// kernel: base_gnn_forward.3
= control target key start
LH: loop header
LB: loop body
LE: loop exit
PB: predicated region body
PF: predicated region fallthrough
CT: control target
= control target key end

     0   :  { %vm96_vm0 = vcmask 523264   ;;  %vm514_vm1 = vcmask 1043456   ;;  %vm501_vm2 = vcmask 64512   ;;  %s1477_s1 = inlined_call_operand.vmem [shape: bf16[64,128], index: 1, kind: input, shape index: {}]   ;;  %s1478_s0 = inlined_call_operand.vmem [shape: bf16[64,64], index: 0, kind: input, shape index: {}]   ;;  %s1479_s4 = inlined_call_operand.vmem [shape: bf16[128,256], index: 4, kind: input, shape index: {}]   ;;  %s1480_s5 = inlined_call_operand.vmem [shape: bf16[8,256], index: 5, kind: input, shape index: {}]   ;;  %s1481_s2 = inlined_call_operand.vmem [shape: bf16[64,8], index: 2, kind: input, shape index: {}]   ;;  %s1482_s3 = inlined_call_operand.vmem [shape: bf16[64,8], index: 3, kind: input, shape index: {}]   ;;  %s1483_s7 = inlined_call_operand.vmem [shape: bf16[128,128], index: 7, kind: input, shape index: {}]   ;;  %s1484_s6 = inlined_call_operand.vmem [shape: f32[1,128], index: 6, kind: input, shape index: {}]   ;;  %s1485_s9 = inlined_call_operand.vmem [shape: bf16[64,128], index: 9, kind: output, shape index: {0}]   ;;  %s1486_s8 = inlined_call_operand.vmem [shape: f32[1,128], index: 8, kind: input, shape index: {}]   ;;  %s1487_s10 = inlined_call_operand.vmem [shape: f32[64,128], index: 10, kind: output, shape index: {1}]  }
   0x1   :  { %v1186_v0 = vld [vmem:[%s1477_s1 + $0x18] sm:$0xff]   ;;  %v1187_v1 = vld [vmem:[%s1477_s1 + $0x10] sm:$0xff]   ;;  %v1188_v2 = vld [vmem:[%s1477_s1 + $0x8] sm:$0xff]  }
   0x2   :  { %1076 = vmatprep.subr.bf16.mxu0 %v1186_v0  ;;  %v1190_v3 = vld [vmem:[%s1478_s0] sm:$0xff]   ;;  %v1194_v5 = vld [vmem:[%s1479_s4 + $0x74] ss:$8 sps:$4 sm:$0xff]   ;;  %v1198_v8 = vld [vmem:[%s1479_s4 + $0x70] ss:$8 sps:$4 sm:$0xff]  }
   0x3   :  { %1077 = vmatpush3.bf16.msra.mxu0 %v1186_v0  ;;  %1084 = vmatprep.mubr.msk.bf16.mxu0 %vm96_vm0, %v1190_v3  ;;  %v1189_v4 = vld [vmem:[%s1477_s1] sm:$0xff]   ;;  %v1196_v7 = vld [vmem:[%s1479_s4 + $0x54] ss:$8 sps:$4 sm:$0xff]   ;;  %v1191_v9 = vld [vmem:[%s1478_s0 + $0x8] sm:$0xff]  }
   0x4   :  { %1078 = vmatprep.subr.bf16.mxu0 %v1187_v1  ;;  %v1195_v6 = vld [vmem:[%s1479_s4 + $0x64] ss:$8 sps:$4 sm:$0xff]   ;;  %1092 = vmatprep.subr.bf16.mxu1 %v1194_v5  ;;  %v1192_v10 = vld [vmem:[%s1478_s0 + $0x10] sm:$0xff]   ;;  %v1200_v12 = vld [vmem:[%s1479_s4 + $0x60] ss:$8 sps:$4 sm:$0xff]  }
   0x5   :  { %1093 = vmatpush3.bf16.msra.mxu1 %v1194_v5  ;;  %v1197_v11 = vld [vmem:[%s1479_s4 + $0x44] ss:$8 sps:$4 sm:$0xff]   ;;  %v1199_v13 = vld [vmem:[%s1479_s4 + $0x34] ss:$8 sps:$4 sm:$0xff]   ;;  %v1202_v15 = vld [vmem:[%s1479_s4 + $0x50] ss:$8 sps:$4 sm:$0xff]  }
   0x6   :  { %1094 = vmatprep.subr.bf16.mxu1 %v1195_v6  ;;  %v1193_v14 = vld [vmem:[%s1478_s0 + $0x18] sm:$0xff]   ;;  %v1207_v16 = vld [vmem:[%s1477_s1] sm:$0xff]   ;;  %v1208_v23 = vld [vmem:[%s1477_s1 + $0x8] sm:$0xff]  }
   0x7   :  { %1079 = vmatpush3.bf16.msra.mxu0 %v1187_v1  ;;  %v1201_v17 = vld [vmem:[%s1479_s4 + $0x24] ss:$8 sps:$4 sm:$0xff]   ;;  %v1204_v18 = vld [vmem:[%s1479_s4 + $0x40] ss:$8 sps:$4 sm:$0xff]   ;;  %1108 = vmatprep.mubr.bf16.mxu1 %v1207_v16  ;;  %v1203_v19 = vld [vmem:[%s1479_s4 + $0x14] ss:$8 sps:$4 sm:$0xff]  }
   0x8   :  { %1080 = vmatprep.subr.bf16.mxu0 %v1188_v2  ;;  %v1206_v20 = vld [vmem:[%s1479_s4 + $0x30] ss:$8 sps:$4 sm:$0xff]   ;;  %v1205_v21 = vld [vmem:[%s1479_s4 + $0x4] ss:$8 sps:$4 sm:$0xff]   ;;  %v1209_v22 = vld [vmem:[%s1479_s4 + $0x20] ss:$8 sps:$4 sm:$0xff]  }
   0x9   :  { %1095 = vmatpush3.bf16.msra.mxu1 %v1195_v6  ;;  %v1210_v24 = vld [vmem:[%s1479_s4 + $0x10] ss:$8 sps:$4 sm:$0xff]   ;;  %v1213_v27 = vld [vmem:[%s1479_s4] ss:$8 sps:$4 sm:$0xff]   ;;  %v599_v30 = vld [vmem:[%s1480_s5 + $0x4] sm:$0xf] }
   0xa   :  { %1096 = vmatprep.subr.bf16.mxu1 %v1196_v7  ;;  %v1211_v25 = vld [vmem:[%s1477_s1 + $0x10] sm:$0xff]   ;;  %v1212_v26 = vld [vmem:[%s1477_s1 + $0x18] sm:$0xff]   ;;  %v480_v28 = vld [vmem:[%s1480_s5] sm:$0xf]  ;;  %v633_v31 = vsel %vm514_vm1, %v599_v30, 0 }
   0xb   :  { %1081 = vmatpush3.bf16.msra.mxu0 %v1188_v2  ;;  %v516_v29 = vsel %vm514_vm1, %v480_v28, 0  ;;  %v1214_v32 = vld [vmem:[%s1481_s2] sm:$0xff]   ;;  %v1215_v33 = vld [vmem:[%s1481_s2 + $0x8] sm:$0xff]   ;;  %v1216_v34 = vld [vmem:[%s1481_s2 + $0x10] sm:$0xff]  }
   0xc   :  { %1082 = vmatprep.subr.bf16.mxu0 %v1189_v4  ;;  %v1217_v35 = vld [vmem:[%s1481_s2 + $0x18] sm:$0xff]   ;;  %v1218_v47 = vld [vmem:[%s1482_s3] sm:$0xff]   ;;  %v1219_v49 = vld [vmem:[%s1482_s3 + $0x8] sm:$0xff]  }
   0xd   :  { %1097 = vmatpush3.bf16.msra.mxu1 %v1196_v7  ;;  %v1220_v50 = vld [vmem:[%s1482_s3 + $0x10] sm:$0xff]   ;;  %v1221_v51 = vld [vmem:[%s1482_s3 + $0x18] sm:$0xff]   ;;  %v1224_v54 = vld [vmem:[%s1483_s7 + $0x28] sm:$0xff]  }
   0xe   :  { %1098 = vmatprep.subr.bf16.mxu1 %v1197_v11  ;;  %v1222_v52 = vld [vmem:[%s1483_s7 + $0x38] sm:$0xff]   ;;  %v1223_v53 = vld [vmem:[%s1483_s7 + $0x30] sm:$0xff]   ;;  %v1225_v55 = vld [vmem:[%s1483_s7 + $0x20] sm:$0xff]  }
   0xf   :  { %1083 = vmatpush3.bf16.msra.mxu0 %v1189_v4  ;;  %v1226_v56 = vld [vmem:[%s1483_s7 + $0x18] sm:$0xff]   ;;  %v1227_v57 = vld [vmem:[%s1483_s7 + $0x10] sm:$0xff]   ;;  %v1228_v58 = vld [vmem:[%s1483_s7 + $0x8] sm:$0xff]  }
  0x10   :  { %1116 = vmatprep.subr.bf16.mxu0 %v1198_v8  ;;  %v1229_v59 = vld [vmem:[%s1483_s7] sm:$0xff]  }
  0x11   :  { %1099 = vmatpush3.bf16.msra.mxu1 %v1197_v11 }
  0x12   :  { %1085 = vmatmul.mubr.msk.bf16.vlgmr.msra.gmra.mxu0 %vm96_vm0, %v1191_v9  ;;  %1100 = vmatprep.subr.bf16.mxu1 %v1199_v13 }
  0x13   :  { %1088 = vmatprep.mubr.msk.bf16.mxu0 %vm96_vm0, %v1192_v10  ;;  %1117 = vmatpush3.bf16.msra.mxu0 %v1198_v8 }
  0x14   :  { %1118 = vmatprep.subr.bf16.mxu0 %v1200_v12 }
  0x15   :  { %1101 = vmatpush3.bf16.msra.mxu1 %v1199_v13 }
  0x16   :  { %1102 = vmatprep.subr.bf16.mxu1 %v1201_v17 }
  0x17   :  { %1119 = vmatpush3.bf16.msra.mxu0 %v1200_v12 }
  0x18   :  { %1120 = vmatprep.subr.bf16.mxu0 %v1202_v15 }
  0x19   :  { %1103 = vmatpush3.bf16.msra.mxu1 %v1201_v17 }
  0x1a   :  { %1089 = vmatmul.mubr.msk.bf16.gmra.mxu0 %vm96_vm0, %v1193_v14  ;;  %1104 = vmatprep.subr.bf16.mxu1 %v1203_v19 }
  0x1b   :  { %1121 = vmatpush3.bf16.msra.mxu0 %v1202_v15 }
  0x1c   :  { %1122 = vmatprep.subr.bf16.mxu0 %v1204_v18 }
  0x1d   :  { %1105 = vmatpush3.bf16.msra.mxu1 %v1203_v19 }
  0x1e   :  { %1106 = vmatprep.subr.bf16.mxu1 %v1205_v21 }
  0x1f   :  { %1123 = vmatpush3.bf16.msra.mxu0 %v1204_v18 }
  0x20   :  { %1124 = vmatprep.subr.bf16.mxu0 %v1206_v20 }
  0x21   :  { %1107 = vmatpush3.bf16.msra.mxu1 %v1205_v21 }
  0x22   :  { %1184 = vmatprep.subr.msk.bf16.mxu1 %vm514_vm1, %v480_v28 }
  0x23   :  { %1125 = vmatpush3.bf16.msra.mxu0 %v1206_v20 }
  0x24   :  { %1126 = vmatprep.subr.bf16.mxu0 %v1209_v22  ;;  %1109 = vmatmul.mubr.bf16.vlgmr.msra.gmra.mxu1 %v1208_v23 }
  0x25   :  { %1112 = vmatprep.mubr.bf16.mxu1 %v1211_v25  ;;  %1141 = vmatpush3.bf16.msra.mxu1 %v516_v29 }
  0x26   :  { %1160 = vmatprep.subr.bf16.mxu1 %v1222_v52 }
  0x27   :  { %1127 = vmatpush3.bf16.msra.mxu0 %v1209_v22 }
  0x28   :  { %1128 = vmatprep.subr.bf16.mxu0 %v1210_v24 }
  0x2b   :  { %1129 = vmatpush3.bf16.msra.mxu0 %v1210_v24 }
  0x2c   :  { %1113 = vmatmul.mubr.bf16.gmra.mxu1 %v1212_v26  ;;  %1130 = vmatprep.subr.bf16.mxu0 %v1213_v27  ;;  %v973_v26 = vld [vmem:[%s1484_s6] ss:$0 sm:$0xff] }
  0x2d   :  { %1142 = vmatprep.mubr.msk.bf16.mxu1 %vm501_vm2, %v1214_v32 }
  0x2f   :  { %1131 = vmatpush3.bf16.msra.mxu0 %v1213_v27 }
  0x30   :  { %1185 = vmatprep.subr.msk.bf16.mxu0 %vm514_vm1, %v599_v30 }
  0x34   :  { %1143 = vmatmul.mubr.msk.bf16.vlgmr.msra.gmra.mxu1 %vm501_vm2, %v1215_v33 }
  0x35   :  { %1146 = vmatprep.mubr.msk.bf16.mxu1 %vm501_vm2, %v1216_v34  ;;  %1161 = vmatpush3.bf16.msra.mxu1 %v1222_v52 }
  0x36   :  { %1162 = vmatprep.subr.bf16.mxu1 %v1223_v53 }
  0x39   :  { %1163 = vmatpush3.bf16.msra.mxu1 %v1223_v53 }
  0x3a   :  { %1164 = vmatprep.subr.bf16.mxu1 %v1224_v54 }
  0x3c   :  { %1147 = vmatmul.mubr.msk.bf16.gmra.mxu1 %vm501_vm2, %v1217_v35 }
  0x3d   :  { %1165 = vmatpush3.bf16.msra.mxu1 %v1224_v54 }
  0x3e   :  { %1166 = vmatprep.subr.bf16.mxu1 %v1225_v55 }
  0x41   :  { %1167 = vmatpush3.bf16.msra.mxu1 %v1225_v55 }
  0x42   :  { %1168 = vmatprep.subr.bf16.mxu1 %v1226_v56 }
  0x45   :  { %1169 = vmatpush3.bf16.msra.mxu1 %v1226_v56 }
  0x46   :  { %1170 = vmatprep.subr.bf16.mxu1 %v1227_v57 }
  0x49   :  { %1171 = vmatpush3.bf16.msra.mxu1 %v1227_v57 }
  0x4a   :  { %1172 = vmatprep.subr.bf16.mxu1 %v1228_v58 }
  0x4d   :  { %1173 = vmatpush3.bf16.msra.mxu1 %v1228_v58 }
  0x4e   :  { %1174 = vmatprep.subr.bf16.mxu1 %v1229_v59 }
  0x51   :  { %1175 = vmatpush3.bf16.msra.mxu1 %v1229_v59 }
  0xd2   :  { %v1086_v36 = vpop.f32.mrf.mxu0 }
  0xd4   :  { %v143_v37 = vpop.f32.mrf.mxu0 }
  0xd6   :  { %v1087_v38 = vpop.f32.mrf.mxu0 }
  0xd7   :  { %v175_v41 = vpack.c.bf16 %v1087_v38, %v1086_v36 }
  0xd8   :  { %v146_v39 = vpop.f32.mrf.mxu0 }
  0xd9   :  { %v174_v40 = vpack.c.bf16 %v146_v39, %v143_v37 }
  0xda   :  { %v1090_v42 = vpop.f32.mrf.mxu0 }
  0xdb   :  { %1132 = vmatprep.mubr.bf16.mxu0 %v174_v40 }
  0xdc   :  { %v159_v43 = vpop.f32.mrf.mxu0  ;;  %1133 = vmatmul.mubr.bf16.vlgmr.msra.gmra.mxu0 %v175_v41 }
  0xdd   :  { %1151 = vmatpush3.bf16.msra.mxu0 %v633_v31 }
  0xde   :  { %v1091_v44 = vpop.f32.mrf.mxu0 }
  0xdf   :  { %v177_v48 = vpack.c.bf16 %v1091_v44, %v1090_v42 }
  0xe0   :  { %v162_v45 = vpop.f32.mrf.mxu0 }
  0xe1   :  { %v176_v46 = vpack.c.bf16 %v162_v45, %v159_v43 }
  0xe3   :  { %1136 = vmatprep.mubr.bf16.mxu0 %v176_v46 }
  0xe4   :  { %1137 = vmatmul.mubr.bf16.gmra.mxu0 %v177_v48  ;;  %v1110_v60 = vpop.f32.mrf.mxu1 }
  0xe5   :  { %1152 = vmatprep.mubr.msk.bf16.mxu0 %vm501_vm2, %v1218_v47 }
  0xe6   :  { %v328_v61 = vpop.f32.mrf.mxu1 }
  0xe8   :  { %v1111_v62 = vpop.f32.mrf.mxu1 }
  0xea   :  { %v331_v63 = vpop.f32.mrf.mxu1 }
  0xec   :  { %1153 = vmatmul.mubr.msk.bf16.vlgmr.msra.gmra.mxu0 %vm501_vm2, %v1219_v49  ;;  %v1114_v0 = vpop.f32.mrf.mxu1 }
  0xed   :  { %1156 = vmatprep.mubr.msk.bf16.mxu0 %vm501_vm2, %v1220_v50 }
  0xee   :  { %v344_v1 = vpop.f32.mrf.mxu1 }
  0xf0   :  { %v1115_v2 = vpop.f32.mrf.mxu1 }
  0xf2   :  { %v347_v3 = vpop.f32.mrf.mxu1 }
  0xf4   :  { %1157 = vmatmul.mubr.msk.bf16.gmra.mxu0 %vm501_vm2, %v1221_v51  ;;  %v1144_v4 = vpop.f32.mrf.mxu1 }
  0xf6   :  { %v552_v7 = vpop.f32.mrf.mxu1 }
  0xf8   :  { %v1145_v10 = vpop.f32.mrf.mxu1 }
  0xfa   :  { %v555_v12 = vpop.f32.mrf.mxu1 }
  0xfc   :  { %v1148_v17 = vpop.f32.mrf.mxu1 }
  0xfe   :  { %v568_v25 = vpop.f32.mrf.mxu1 }
 0x100   :  { %v1149_v37 = vpop.f32.mrf.mxu1 }
 0x102   :  { %v571_v51 = vpop.f32.mrf.mxu1 }
 0x19c   :  { %v1134_v5 = vpop.f32.mrf.mxu0 }
 0x19d   :  { %v450_v14 = vadd.f32 %v1134_v5, %v1110_v60 }
 0x19e   :  { %v441_v6 = vpop.f32.mrf.mxu0 }
 0x19f   :  { %v442_v16 = vadd.f32 %v441_v6, %v328_v61  ;;  %v585_v19 = vadd.f32 %v1144_v4, %v450_v14 }
 0x1a0   :  { %v1135_v8 = vpop.f32.mrf.mxu0 }
 0x1a1   :  { %v453_v20 = vadd.f32 %v1135_v8, %v1111_v62  ;;  %v583_v22 = vadd.f32 %v552_v7, %v442_v16 }
 0x1a2   :  { %v444_v9 = vpop.f32.mrf.mxu0 }
 0x1a3   :  { %v445_v23 = vadd.f32 %v444_v9, %v331_v63  ;;  %v586_v28 = vadd.f32 %v1145_v10, %v453_v20  ;;  %v982_v9 = vld [vmem:[%s1486_s8] ss:$0 sm:$0xff] }
 0x1a4   :  { %v1138_v11 = vpop.f32.mrf.mxu0 }
 0x1a5   :  { %v466_v29 = vadd.f32 %v1138_v11, %v1114_v0  ;;  %v584_v33 = vadd.f32 %v555_v12, %v445_v23 }
 0x1a6   :  { %v457_v13 = vpop.f32.mrf.mxu0 }
 0x1a7   :  { %v458_v31 = vadd.f32 %v457_v13, %v344_v1  ;;  %v589_v39 = vadd.f32 %v1148_v17, %v466_v29 }
 0x1a8   :  { %v1139_v15 = vpop.f32.mrf.mxu0 }
 0x1a9   :  { %v469_v36 = vadd.f32 %v1139_v15, %v1115_v2  ;;  %v587_v43 = vadd.f32 %v568_v25, %v458_v31 }
 0x1aa   :  { %v460_v18 = vpop.f32.mrf.mxu0 }
 0x1ab   :  { %v461_v44 = vadd.f32 %v460_v18, %v347_v3  ;;  %v590_v50 = vadd.f32 %v1149_v37, %v469_v36 }
 0x1ac   :  { %v1154_v21 = vpop.f32.mrf.mxu0 }
 0x1ad   :  { %v702_v24 = vadd.f32 %v1154_v21, %v585_v19  ;;  %v588_v58 = vadd.f32 %v571_v51, %v461_v44 }
 0x1ae   :  { %v669_v27 = vpop.f32.mrf.mxu0 }
 0x1af   :  { %v700_v30 = vadd.f32 %v669_v27, %v583_v22  ;;  %v717_v34 = vadd.f32 %v973_v26, %v702_v24 }
 0x1b0   :  { %v1155_v32 = vpop.f32.mrf.mxu0 }
 0x1b1   :  { %v703_v35 = vadd.f32 %v1155_v32, %v586_v28  ;;  %v715_v40 = vadd.f32 %v973_v26, %v700_v30  ;;  %v725_v46 = vmax.f32 %v717_v34, 0.0 }
 0x1b2   :  { %v672_v38 = vpop.f32.mrf.mxu0 }
 0x1b3   :  { %v718_v41 = vadd.f32 %v973_v26, %v703_v35  ;;  %v701_v42 = vadd.f32 %v672_v38, %v584_v33  ;;  %v723_v53 = vmax.f32 %v715_v40, 0.0 }
 0x1b4   :  { %v1158_v45 = vpop.f32.mrf.mxu0 }
 0x1b5   :  { %v726_v47 = vmax.f32 %v718_v41, 0.0  ;;  %v716_v48 = vadd.f32 %v973_v26, %v701_v42  ;;  %v706_v49 = vadd.f32 %v1158_v45, %v589_v39 }
 0x1b6   :  { %v685_v52 = vpop.f32.mrf.mxu0 }
 0x1b7   :  { %v732_v54 = vpack.c.bf16 %v726_v47, %v725_v46  ;;  %v724_v55 = vmax.f32 %v716_v48, 0.0  ;;  %v704_v56 = vadd.f32 %v685_v52, %v587_v43  ;;  %v721_v59 = vadd.f32 %v973_v26, %v706_v49 }
 0x1b8   :  { %v1159_v57 = vpop.f32.mrf.mxu0 }
 0x1b9   :  { %1019 = vst [vmem:[%s1485_s9 + $0x8] sm:$0xff] %v732_v54   ;;  %v707_v60 = vadd.f32 %v1159_v57, %v590_v50  ;;  %v731_v61 = vpack.c.bf16 %v724_v55, %v723_v53  ;;  %v719_v63 = vadd.f32 %v973_v26, %v704_v56  ;;  %v729_v2 = vmax.f32 %v721_v59, 0.0 }
 0x1ba   :  { %v688_v62 = vpop.f32.mrf.mxu0 }
 0x1bb   :  { %v722_v0 = vadd.f32 %v973_v26, %v707_v60  ;;  %v705_v1 = vadd.f32 %v688_v62, %v588_v58  ;;  %1003 = vst [vmem:[%s1485_s9] sm:$0xff] %v731_v61   ;;  %1176 = vmatprep.mubr.bf16.mxu1 %v731_v61  ;;  %v727_v5 = vmax.f32 %v719_v63, 0.0 }
 0x1bc   :  { %1177 = vmatmul.mubr.bf16.vlgmr.msra.gmra.mxu1 %v732_v54 }
 0x1bd   :  { %v730_v3 = vmax.f32 %v722_v0, 0.0  ;;  %v720_v4 = vadd.f32 %v973_v26, %v705_v1 }
 0x1bf   :  { %v728_v6 = vmax.f32 %v720_v4, 0.0  ;;  %v734_v7 = vpack.c.bf16 %v730_v3, %v729_v2 }
 0x1c1   :  { %v733_v8 = vpack.c.bf16 %v728_v6, %v727_v5  ;;  %1021 = vst [vmem:[%s1485_s9 + $0x18] sm:$0xff] %v734_v7  }
 0x1c3   :  { %1020 = vst [vmem:[%s1485_s9 + $0x10] sm:$0xff] %v733_v8   ;;  %1180 = vmatprep.mubr.bf16.mxu1 %v733_v8 }
 0x1c4   :  { %1181 = vmatmul.mubr.bf16.gmra.mxu1 %v734_v7 }
 0x27c   :  { %v1178_v10 = vpop.f32.mrf.mxu1 }
 0x27d   :  { %v885_v11 = vadd.f32 %v1178_v10, %v982_v9 }
 0x27e   :  { %v876_v12 = vpop.f32.mrf.mxu1 }
 0x27f   :  { %909 = vst [vmem:[%s1487_s10 + $0x10] sm:$0xff] %v885_v11  ;;  %v877_v13 = vadd.f32 %v982_v9, %v876_v12 }
 0x280   :  { %v1179_v14 = vpop.f32.mrf.mxu1 }
 0x281   :  { %907 = vst [vmem:[%s1487_s10] sm:$0xff] %v877_v13  ;;  %v888_v15 = vadd.f32 %v1179_v14, %v982_v9 }
 0x282   :  { %v879_v16 = vpop.f32.mrf.mxu1 }
 0x283   :  { %910 = vst [vmem:[%s1487_s10 + $0x18] sm:$0xff] %v888_v15  ;;  %v880_v17 = vadd.f32 %v982_v9, %v879_v16 }
 0x284   :  { %v1182_v18 = vpop.f32.mrf.mxu1 }
 0x285   :  { %908 = vst [vmem:[%s1487_s10 + $0x8] sm:$0xff] %v880_v17  ;;  %v901_v19 = vadd.f32 %v1182_v18, %v982_v9 }
 0x286   :  { %v892_v20 = vpop.f32.mrf.mxu1 }
 0x287   :  { %913 = vst [vmem:[%s1487_s10 + $0x30] sm:$0xff] %v901_v19  ;;  %v893_v21 = vadd.f32 %v982_v9, %v892_v20 }
 0x288   :  { %v1183_v22 = vpop.f32.mrf.mxu1 }
 0x289   :  { %911 = vst [vmem:[%s1487_s10 + $0x20] sm:$0xff] %v893_v21  ;;  %v904_v23 = vadd.f32 %v1183_v22, %v982_v9 }
 0x28a   :  { %v895_v24 = vpop.f32.mrf.mxu1 }
 0x28b   :  { %914 = vst [vmem:[%s1487_s10 + $0x38] sm:$0xff] %v904_v23  ;;  %v896_v25 = vadd.f32 %v982_v9, %v895_v24 }
 0x28d   :  { %912 = vst [vmem:[%s1487_s10 + $0x28] sm:$0xff] %v896_v25 }

</bundles_post_ra>
